<compile_context>
chip_gen: v7x
topology: tpu7x:2x2x1
jax: 0.10.0
libtpu: 0.0.40
codegen_flags: <defaults>
</compile_context>

<pallas_src>
import functools

import jax
import jax.numpy as jnp
from jax.experimental import pallas as pl
from jax.experimental.pallas import tpu as pltpu


def _mean_ensemble_kernel(x_ref, w_ref, b_ref, bits_ref, out_ref, *,
                          num_passes, keep_prob):
    # ---- pass-invariant inner forward: Linear -> ReLU, computed once ----
    y = jnp.dot(x_ref[...], w_ref[...], preferred_element_type=jnp.float32)
    y = jnp.maximum(y + b_ref[...].astype(jnp.float32), jnp.float32(0.0))

    # ---- dropout keep-count over all passes (integer threshold, vreg accumulator) ----
    thr = jnp.int32(int(round(keep_prob * (1 << 24))))      # bits are uniform in [0, 2^24)
    mask_sum = jnp.zeros(out_ref.shape, jnp.float32)
    for t in range(num_passes):                              # static unroll, compare + add only
        mask_sum = mask_sum + (bits_ref[t] < thr).astype(jnp.float32)

    # mean over passes of  y * mask_t / keep_prob  ==  y * mask_sum / (N * keep_prob)
    scale = jnp.float32(1.0 / (num_passes * keep_prob))
    out_ref[...] = (y * mask_sum * scale).astype(out_ref.dtype)


def _linear_relu_kernel(x_ref, w_ref, b_ref, out_ref):
    # Deterministic path (non-stochastic eval, or dropout_p == 0): single inner forward.
    y = jnp.dot(x_ref[...], w_ref[...], preferred_element_type=jnp.float32)
    y = jnp.maximum(y + b_ref[...].astype(jnp.float32), jnp.float32(0.0))
    out_ref[...] = y.astype(out_ref.dtype)


def mean_ensemble(x, w, b, key, *, num_passes=20, dropout_p=0.5, stochastic=True):
    """Pallas implementation of MeanEnsemble.forward.

    stochastic=True  -> mean of `num_passes` dropout-perturbed inner forwards.
    stochastic=False -> single deterministic inner forward (dropout off).
    """
    B, Din = x.shape
    Dout = w.shape[1]
    bm = B  # one batch tile at these sizes; tiles over B at larger batch (parallel axis)
    grid = (pl.cdiv(B, bm),)
    cparams = pltpu.CompilerParams(dimension_semantics=("parallel",))

    x_spec = pl.BlockSpec((bm, Din), lambda i: (i, 0))
    w_spec = pl.BlockSpec((Din, Dout), lambda i: (0, 0))
    b_spec = pl.BlockSpec((1, Dout), lambda i: (0, 0))
    o_spec = pl.BlockSpec((bm, Dout), lambda i: (i, 0))

    # Deterministic single pass (also covers stochastic mode with p == 0, where all
    # passes are identical and the mean equals one pass).
    if (not stochastic) or dropout_p <= 0.0:
        return pl.pallas_call(
            _linear_relu_kernel,
            out_shape=jax.ShapeDtypeStruct((B, Dout), x.dtype),
            grid=grid,
            in_specs=[x_spec, w_spec, b_spec],
            out_specs=o_spec,
            compiler_params=cparams,
        )(x, w, b)

    if num_passes < 2:
        raise ValueError("At least two samples are necessary")

    keep_prob = 1.0 - dropout_p
    # 24-bit uniform integers per (pass, row, col); compared in-kernel against an
    # integer threshold (statistically identical to uniform < keep_prob).
    bits = (jax.random.bits(key, (num_passes, B, Dout), dtype=jnp.uint32)
            >> jnp.uint32(8)).astype(jnp.int32)

    kernel = functools.partial(
        _mean_ensemble_kernel, num_passes=num_passes, keep_prob=keep_prob)

    return pl.pallas_call(
        kernel,
        out_shape=jax.ShapeDtypeStruct((B, Dout), x.dtype),
        grid=grid,
        in_specs=[
            x_spec,
            w_spec,
            b_spec,
            pl.BlockSpec((num_passes, bm, Dout), lambda i: (0, i, 0)),
        ],
        out_specs=o_spec,
        compiler_params=cparams,
    )(x, w, b, bits)


if __name__ == "__main__":
    # Deterministic synthetic parameters for the inner module (small shapes).
    B, D_IN, D_OUT = 8, 128, 128
    NUM_PASSES = 20
    DROPOUT_P = 0.5

    key = jax.random.PRNGKey(0)
    kx, kw, kb, kdrop = jax.random.split(key, 4)
    x = jax.random.normal(kx, (B, D_IN), dtype=jnp.float32)
    w = jax.random.normal(kw, (D_IN, D_OUT), dtype=jnp.float32) * (1.0 / D_IN ** 0.5)
    b = jax.random.normal(kb, (1, D_OUT), dtype=jnp.float32) * 0.1

    # Stochastic-eval path: mean over NUM_PASSES dropout-perturbed forwards.
    out_stochastic = mean_ensemble(
        x, w, b, kdrop, num_passes=NUM_PASSES, dropout_p=DROPOUT_P, stochastic=True)
    out_stochastic = jax.block_until_ready(out_stochastic)

    # Non-stochastic path: plain single inner forward.
    out_plain = mean_ensemble(
        x, w, b, kdrop, num_passes=NUM_PASSES, dropout_p=DROPOUT_P, stochastic=False)
    out_plain = jax.block_until_ready(out_plain)

    # --- pure-JAX references ---
    y_ref = jnp.maximum(x @ w + b, 0.0)

    # Stochastic reference: literal mean over passes of dropout-applied forwards,
    # using the same deterministic random bits as the kernel wrapper.
    keep_prob = 1.0 - DROPOUT_P
    bits_ref = (jax.random.bits(kdrop, (NUM_PASSES, B, D_OUT), dtype=jnp.uint32)
                >> jnp.uint32(8)).astype(jnp.int32)
    keep_ref = bits_ref < jnp.int32(int(round(keep_prob * (1 << 24))))
    ref_stochastic = jnp.mean(
        jnp.where(keep_ref, y_ref[None] / keep_prob, 0.0), axis=0)

    assert out_plain.shape == (B, D_OUT)
    assert out_stochastic.shape == (B, D_OUT)
    assert jnp.allclose(out_plain, y_ref, atol=1e-5, rtol=1e-5)
    assert jnp.allclose(out_stochastic, ref_stochastic, atol=1e-4, rtol=1e-4)
    assert jnp.all(jnp.isfinite(out_stochastic))

    print("KERNEL_OK")
</pallas_src>

<mosaic_0001>
module attributes {stable_mosaic.version = 11 : i64} {
  func.func @_mean_ensemble_kernel(%arg0: i32, %arg1: memref<8x128xf32, #tpu.memory_space<vmem>>, %arg2: memref<128x128xf32, #tpu.memory_space<vmem>>, %arg3: memref<1x128xf32, #tpu.memory_space<vmem>>, %arg4: memref<20x8x128xi32, #tpu.memory_space<vmem>>, %arg5: memref<8x128xf32, #tpu.memory_space<vmem>>) attributes {dimension_semantics = [#tpu.dimension_semantics<parallel>], iteration_bounds = array<i64: 1>, scalar_prefetch = 0 : i64, scratch_operands = 0 : i64, tpu.core_type = #tpu.core_type<tc>, window_params = [{transform_indices = @transform_0, window_bounds = array<i64: 8, 128>}, {pipeline_mode = #tpu.pipeline_mode<synchronous>, transform_indices = @transform_1, window_bounds = array<i64: 128, 128>}, {pipeline_mode = #tpu.pipeline_mode<synchronous>, transform_indices = @transform_2, window_bounds = array<i64: 1, 128>}, {transform_indices = @transform_3, window_bounds = array<i64: 20, 8, 128>}, {transform_indices = @transform_4, window_bounds = array<i64: 8, 128>}]} {
    %c0 = arith.constant 0 : index
    %c0_0 = arith.constant 0 : index
    %0 = vector.load %arg1[%c0, %c0_0] : memref<8x128xf32, #tpu.memory_space<vmem>>, vector<8x128xf32>
    %c0_1 = arith.constant 0 : index
    %c0_2 = arith.constant 0 : index
    %1 = vector.load %arg2[%c0_1, %c0_2] : memref<128x128xf32, #tpu.memory_space<vmem>>, vector<128x128xf32>
    %cst = arith.constant dense<0.000000e+00> : vector<8x128xf32>
    %2 = tpu.matmul %0, %1, %cst {dimension_numbers = #tpu.dot_dimension_numbers<[1], [0], [0], [1], [0, 0, 1, 1], [], []>} : vector<8x128xf32>, vector<128x128xf32>, vector<8x128xf32> -> vector<8x128xf32>
    %c0_3 = arith.constant 0 : index
    %c0_4 = arith.constant 0 : index
    %3 = vector.load %arg3[%c0_3, %c0_4] : memref<1x128xf32, #tpu.memory_space<vmem>>, vector<1x128xf32>
    %4 = vector.broadcast %3 : vector<1x128xf32> to vector<8x128xf32>
    %5 = arith.addf %2, %4 : vector<8x128xf32>
    %cst_5 = arith.constant 0.000000e+00 : f32
    %6 = vector.broadcast %cst_5 : f32 to vector<8x128xf32>
    %7 = arith.maximumf %5, %6 : vector<8x128xf32>
    %cst_6 = arith.constant 0.000000e+00 : f32
    %8 = vector.broadcast %cst_6 : f32 to vector<8x128xf32>
    %c0_7 = arith.constant 0 : index
    %c0_8 = arith.constant 0 : index
    %c0_9 = arith.constant 0 : index
    %9 = vector.load %arg4[%c0_7, %c0_8, %c0_9] : memref<20x8x128xi32, #tpu.memory_space<vmem>>, vector<1x8x128xi32>
    %10 = vector.shape_cast %9 : vector<1x8x128xi32> to vector<8x128xi32>
    %c8388608_i32 = arith.constant 8388608 : i32
    %11 = vector.broadcast %c8388608_i32 : i32 to vector<8x128xi32>
    %12 = arith.cmpi slt, %10, %11 : vector<8x128xi32>
    %13 = arith.extui %12 : vector<8x128xi1> to vector<8x128xi32>
    %14 = arith.sitofp %13 : vector<8x128xi32> to vector<8x128xf32>
    %15 = arith.addf %8, %14 : vector<8x128xf32>
    %c1 = arith.constant 1 : index
    %c0_10 = arith.constant 0 : index
    %c0_11 = arith.constant 0 : index
    %16 = vector.load %arg4[%c1, %c0_10, %c0_11] : memref<20x8x128xi32, #tpu.memory_space<vmem>>, vector<1x8x128xi32>
    %17 = vector.shape_cast %16 : vector<1x8x128xi32> to vector<8x128xi32>
    %c8388608_i32_12 = arith.constant 8388608 : i32
    %18 = vector.broadcast %c8388608_i32_12 : i32 to vector<8x128xi32>
    %19 = arith.cmpi slt, %17, %18 : vector<8x128xi32>
    %20 = arith.extui %19 : vector<8x128xi1> to vector<8x128xi32>
    %21 = arith.sitofp %20 : vector<8x128xi32> to vector<8x128xf32>
    %22 = arith.addf %15, %21 : vector<8x128xf32>
    %c2 = arith.constant 2 : index
    %c0_13 = arith.constant 0 : index
    %c0_14 = arith.constant 0 : index
    %23 = vector.load %arg4[%c2, %c0_13, %c0_14] : memref<20x8x128xi32, #tpu.memory_space<vmem>>, vector<1x8x128xi32>
    %24 = vector.shape_cast %23 : vector<1x8x128xi32> to vector<8x128xi32>
    %c8388608_i32_15 = arith.constant 8388608 : i32
    %25 = vector.broadcast %c8388608_i32_15 : i32 to vector<8x128xi32>
    %26 = arith.cmpi slt, %24, %25 : vector<8x128xi32>
    %27 = arith.extui %26 : vector<8x128xi1> to vector<8x128xi32>
    %28 = arith.sitofp %27 : vector<8x128xi32> to vector<8x128xf32>
    %29 = arith.addf %22, %28 : vector<8x128xf32>
    %c3 = arith.constant 3 : index
    %c0_16 = arith.constant 0 : index
    %c0_17 = arith.constant 0 : index
    %30 = vector.load %arg4[%c3, %c0_16, %c0_17] : memref<20x8x128xi32, #tpu.memory_space<vmem>>, vector<1x8x128xi32>
    %31 = vector.shape_cast %30 : vector<1x8x128xi32> to vector<8x128xi32>
    %c8388608_i32_18 = arith.constant 8388608 : i32
    %32 = vector.broadcast %c8388608_i32_18 : i32 to vector<8x128xi32>
    %33 = arith.cmpi slt, %31, %32 : vector<8x128xi32>
    %34 = arith.extui %33 : vector<8x128xi1> to vector<8x128xi32>
    %35 = arith.sitofp %34 : vector<8x128xi32> to vector<8x128xf32>
    %36 = arith.addf %29, %35 : vector<8x128xf32>
    %c4 = arith.constant 4 : index
    %c0_19 = arith.constant 0 : index
    %c0_20 = arith.constant 0 : index
    %37 = vector.load %arg4[%c4, %c0_19, %c0_20] : memref<20x8x128xi32, #tpu.memory_space<vmem>>, vector<1x8x128xi32>
    %38 = vector.shape_cast %37 : vector<1x8x128xi32> to vector<8x128xi32>
    %c8388608_i32_21 = arith.constant 8388608 : i32
    %39 = vector.broadcast %c8388608_i32_21 : i32 to vector<8x128xi32>
    %40 = arith.cmpi slt, %38, %39 : vector<8x128xi32>
    %41 = arith.extui %40 : vector<8x128xi1> to vector<8x128xi32>
    %42 = arith.sitofp %41 : vector<8x128xi32> to vector<8x128xf32>
    %43 = arith.addf %36, %42 : vector<8x128xf32>
    %c5 = arith.constant 5 : index
    %c0_22 = arith.constant 0 : index
    %c0_23 = arith.constant 0 : index
    %44 = vector.load %arg4[%c5, %c0_22, %c0_23] : memref<20x8x128xi32, #tpu.memory_space<vmem>>, vector<1x8x128xi32>
    %45 = vector.shape_cast %44 : vector<1x8x128xi32> to vector<8x128xi32>
    %c8388608_i32_24 = arith.constant 8388608 : i32
    %46 = vector.broadcast %c8388608_i32_24 : i32 to vector<8x128xi32>
    %47 = arith.cmpi slt, %45, %46 : vector<8x128xi32>
    %48 = arith.extui %47 : vector<8x128xi1> to vector<8x128xi32>
    %49 = arith.sitofp %48 : vector<8x128xi32> to vector<8x128xf32>
    %50 = arith.addf %43, %49 : vector<8x128xf32>
    %c6 = arith.constant 6 : index
    %c0_25 = arith.constant 0 : index
    %c0_26 = arith.constant 0 : index
    %51 = vector.load %arg4[%c6, %c0_25, %c0_26] : memref<20x8x128xi32, #tpu.memory_space<vmem>>, vector<1x8x128xi32>
    %52 = vector.shape_cast %51 : vector<1x8x128xi32> to vector<8x128xi32>
    %c8388608_i32_27 = arith.constant 8388608 : i32
    %53 = vector.broadcast %c8388608_i32_27 : i32 to vector<8x128xi32>
    %54 = arith.cmpi slt, %52, %53 : vector<8x128xi32>
    %55 = arith.extui %54 : vector<8x128xi1> to vector<8x128xi32>
    %56 = arith.sitofp %55 : vector<8x128xi32> to vector<8x128xf32>
    %57 = arith.addf %50, %56 : vector<8x128xf32>
    %c7 = arith.constant 7 : index
    %c0_28 = arith.constant 0 : index
    %c0_29 = arith.constant 0 : index
    %58 = vector.load %arg4[%c7, %c0_28, %c0_29] : memref<20x8x128xi32, #tpu.memory_space<vmem>>, vector<1x8x128xi32>
    %59 = vector.shape_cast %58 : vector<1x8x128xi32> to vector<8x128xi32>
    %c8388608_i32_30 = arith.constant 8388608 : i32
    %60 = vector.broadcast %c8388608_i32_30 : i32 to vector<8x128xi32>
    %61 = arith.cmpi slt, %59, %60 : vector<8x128xi32>
    %62 = arith.extui %61 : vector<8x128xi1> to vector<8x128xi32>
    %63 = arith.sitofp %62 : vector<8x128xi32> to vector<8x128xf32>
    %64 = arith.addf %57, %63 : vector<8x128xf32>
    %c8 = arith.constant 8 : index
    %c0_31 = arith.constant 0 : index
    %c0_32 = arith.constant 0 : index
    %65 = vector.load %arg4[%c8, %c0_31, %c0_32] : memref<20x8x128xi32, #tpu.memory_space<vmem>>, vector<1x8x128xi32>
    %66 = vector.shape_cast %65 : vector<1x8x128xi32> to vector<8x128xi32>
    %c8388608_i32_33 = arith.constant 8388608 : i32
    %67 = vector.broadcast %c8388608_i32_33 : i32 to vector<8x128xi32>
    %68 = arith.cmpi slt, %66, %67 : vector<8x128xi32>
    %69 = arith.extui %68 : vector<8x128xi1> to vector<8x128xi32>
    %70 = arith.sitofp %69 : vector<8x128xi32> to vector<8x128xf32>
    %71 = arith.addf %64, %70 : vector<8x128xf32>
    %c9 = arith.constant 9 : index
    %c0_34 = arith.constant 0 : index
    %c0_35 = arith.constant 0 : index
    %72 = vector.load %arg4[%c9, %c0_34, %c0_35] : memref<20x8x128xi32, #tpu.memory_space<vmem>>, vector<1x8x128xi32>
    %73 = vector.shape_cast %72 : vector<1x8x128xi32> to vector<8x128xi32>
    %c8388608_i32_36 = arith.constant 8388608 : i32
    %74 = vector.broadcast %c8388608_i32_36 : i32 to vector<8x128xi32>
    %75 = arith.cmpi slt, %73, %74 : vector<8x128xi32>
    %76 = arith.extui %75 : vector<8x128xi1> to vector<8x128xi32>
    %77 = arith.sitofp %76 : vector<8x128xi32> to vector<8x128xf32>
    %78 = arith.addf %71, %77 : vector<8x128xf32>
    %c10 = arith.constant 10 : index
    %c0_37 = arith.constant 0 : index
    %c0_38 = arith.constant 0 : index
    %79 = vector.load %arg4[%c10, %c0_37, %c0_38] : memref<20x8x128xi32, #tpu.memory_space<vmem>>, vector<1x8x128xi32>
    %80 = vector.shape_cast %79 : vector<1x8x128xi32> to vector<8x128xi32>
    %c8388608_i32_39 = arith.constant 8388608 : i32
    %81 = vector.broadcast %c8388608_i32_39 : i32 to vector<8x128xi32>
    %82 = arith.cmpi slt, %80, %81 : vector<8x128xi32>
    %83 = arith.extui %82 : vector<8x128xi1> to vector<8x128xi32>
    %84 = arith.sitofp %83 : vector<8x128xi32> to vector<8x128xf32>
    %85 = arith.addf %78, %84 : vector<8x128xf32>
    %c11 = arith.constant 11 : index
    %c0_40 = arith.constant 0 : index
    %c0_41 = arith.constant 0 : index
    %86 = vector.load %arg4[%c11, %c0_40, %c0_41] : memref<20x8x128xi32, #tpu.memory_space<vmem>>, vector<1x8x128xi32>
    %87 = vector.shape_cast %86 : vector<1x8x128xi32> to vector<8x128xi32>
    %c8388608_i32_42 = arith.constant 8388608 : i32
    %88 = vector.broadcast %c8388608_i32_42 : i32 to vector<8x128xi32>
    %89 = arith.cmpi slt, %87, %88 : vector<8x128xi32>
    %90 = arith.extui %89 : vector<8x128xi1> to vector<8x128xi32>
    %91 = arith.sitofp %90 : vector<8x128xi32> to vector<8x128xf32>
    %92 = arith.addf %85, %91 : vector<8x128xf32>
    %c12 = arith.constant 12 : index
    %c0_43 = arith.constant 0 : index
    %c0_44 = arith.constant 0 : index
    %93 = vector.load %arg4[%c12, %c0_43, %c0_44] : memref<20x8x128xi32, #tpu.memory_space<vmem>>, vector<1x8x128xi32>
    %94 = vector.shape_cast %93 : vector<1x8x128xi32> to vector<8x128xi32>
    %c8388608_i32_45 = arith.constant 8388608 : i32
    %95 = vector.broadcast %c8388608_i32_45 : i32 to vector<8x128xi32>
    %96 = arith.cmpi slt, %94, %95 : vector<8x128xi32>
    %97 = arith.extui %96 : vector<8x128xi1> to vector<8x128xi32>
    %98 = arith.sitofp %97 : vector<8x128xi32> to vector<8x128xf32>
    %99 = arith.addf %92, %98 : vector<8x128xf32>
    %c13 = arith.constant 13 : index
    %c0_46 = arith.constant 0 : index
    %c0_47 = arith.constant 0 : index
    %100 = vector.load %arg4[%c13, %c0_46, %c0_47] : memref<20x8x128xi32, #tpu.memory_space<vmem>>, vector<1x8x128xi32>
    %101 = vector.shape_cast %100 : vector<1x8x128xi32> to vector<8x128xi32>
    %c8388608_i32_48 = arith.constant 8388608 : i32
    %102 = vector.broadcast %c8388608_i32_48 : i32 to vector<8x128xi32>
    %103 = arith.cmpi slt, %101, %102 : vector<8x128xi32>
    %104 = arith.extui %103 : vector<8x128xi1> to vector<8x128xi32>
    %105 = arith.sitofp %104 : vector<8x128xi32> to vector<8x128xf32>
    %106 = arith.addf %99, %105 : vector<8x128xf32>
    %c14 = arith.constant 14 : index
    %c0_49 = arith.constant 0 : index
    %c0_50 = arith.constant 0 : index
    %107 = vector.load %arg4[%c14, %c0_49, %c0_50] : memref<20x8x128xi32, #tpu.memory_space<vmem>>, vector<1x8x128xi32>
    %108 = vector.shape_cast %107 : vector<1x8x128xi32> to vector<8x128xi32>
    %c8388608_i32_51 = arith.constant 8388608 : i32
    %109 = vector.broadcast %c8388608_i32_51 : i32 to vector<8x128xi32>
    %110 = arith.cmpi slt, %108, %109 : vector<8x128xi32>
    %111 = arith.extui %110 : vector<8x128xi1> to vector<8x128xi32>
    %112 = arith.sitofp %111 : vector<8x128xi32> to vector<8x128xf32>
    %113 = arith.addf %106, %112 : vector<8x128xf32>
    %c15 = arith.constant 15 : index
    %c0_52 = arith.constant 0 : index
    %c0_53 = arith.constant 0 : index
    %114 = vector.load %arg4[%c15, %c0_52, %c0_53] : memref<20x8x128xi32, #tpu.memory_space<vmem>>, vector<1x8x128xi32>
    %115 = vector.shape_cast %114 : vector<1x8x128xi32> to vector<8x128xi32>
    %c8388608_i32_54 = arith.constant 8388608 : i32
    %116 = vector.broadcast %c8388608_i32_54 : i32 to vector<8x128xi32>
    %117 = arith.cmpi slt, %115, %116 : vector<8x128xi32>
    %118 = arith.extui %117 : vector<8x128xi1> to vector<8x128xi32>
    %119 = arith.sitofp %118 : vector<8x128xi32> to vector<8x128xf32>
    %120 = arith.addf %113, %119 : vector<8x128xf32>
    %c16 = arith.constant 16 : index
    %c0_55 = arith.constant 0 : index
    %c0_56 = arith.constant 0 : index
    %121 = vector.load %arg4[%c16, %c0_55, %c0_56] : memref<20x8x128xi32, #tpu.memory_space<vmem>>, vector<1x8x128xi32>
    %122 = vector.shape_cast %121 : vector<1x8x128xi32> to vector<8x128xi32>
    %c8388608_i32_57 = arith.constant 8388608 : i32
    %123 = vector.broadcast %c8388608_i32_57 : i32 to vector<8x128xi32>
    %124 = arith.cmpi slt, %122, %123 : vector<8x128xi32>
    %125 = arith.extui %124 : vector<8x128xi1> to vector<8x128xi32>
    %126 = arith.sitofp %125 : vector<8x128xi32> to vector<8x128xf32>
    %127 = arith.addf %120, %126 : vector<8x128xf32>
    %c17 = arith.constant 17 : index
    %c0_58 = arith.constant 0 : index
    %c0_59 = arith.constant 0 : index
    %128 = vector.load %arg4[%c17, %c0_58, %c0_59] : memref<20x8x128xi32, #tpu.memory_space<vmem>>, vector<1x8x128xi32>
    %129 = vector.shape_cast %128 : vector<1x8x128xi32> to vector<8x128xi32>
    %c8388608_i32_60 = arith.constant 8388608 : i32
    %130 = vector.broadcast %c8388608_i32_60 : i32 to vector<8x128xi32>
    %131 = arith.cmpi slt, %129, %130 : vector<8x128xi32>
    %132 = arith.extui %131 : vector<8x128xi1> to vector<8x128xi32>
    %133 = arith.sitofp %132 : vector<8x128xi32> to vector<8x128xf32>
    %134 = arith.addf %127, %133 : vector<8x128xf32>
    %c18 = arith.constant 18 : index
    %c0_61 = arith.constant 0 : index
    %c0_62 = arith.constant 0 : index
    %135 = vector.load %arg4[%c18, %c0_61, %c0_62] : memref<20x8x128xi32, #tpu.memory_space<vmem>>, vector<1x8x128xi32>
    %136 = vector.shape_cast %135 : vector<1x8x128xi32> to vector<8x128xi32>
    %c8388608_i32_63 = arith.constant 8388608 : i32
    %137 = vector.broadcast %c8388608_i32_63 : i32 to vector<8x128xi32>
    %138 = arith.cmpi slt, %136, %137 : vector<8x128xi32>
    %139 = arith.extui %138 : vector<8x128xi1> to vector<8x128xi32>
    %140 = arith.sitofp %139 : vector<8x128xi32> to vector<8x128xf32>
    %141 = arith.addf %134, %140 : vector<8x128xf32>
    %c19 = arith.constant 19 : index
    %c0_64 = arith.constant 0 : index
    %c0_65 = arith.constant 0 : index
    %142 = vector.load %arg4[%c19, %c0_64, %c0_65] : memref<20x8x128xi32, #tpu.memory_space<vmem>>, vector<1x8x128xi32>
    %143 = vector.shape_cast %142 : vector<1x8x128xi32> to vector<8x128xi32>
    %c8388608_i32_66 = arith.constant 8388608 : i32
    %144 = vector.broadcast %c8388608_i32_66 : i32 to vector<8x128xi32>
    %145 = arith.cmpi slt, %143, %144 : vector<8x128xi32>
    %146 = arith.extui %145 : vector<8x128xi1> to vector<8x128xi32>
    %147 = arith.sitofp %146 : vector<8x128xi32> to vector<8x128xf32>
    %148 = arith.addf %141, %147 : vector<8x128xf32>
    %149 = arith.mulf %7, %148 : vector<8x128xf32>
    %cst_67 = arith.constant 1.000000e-01 : f32
    %150 = vector.broadcast %cst_67 : f32 to vector<8x128xf32>
    %151 = arith.mulf %149, %150 : vector<8x128xf32>
    %c0_68 = arith.constant 0 : index
    %c0_69 = arith.constant 0 : index
    %152 = vector.load %arg5[%c0_68, %c0_69] : memref<8x128xf32, #tpu.memory_space<vmem>>, vector<8x128xf32>
    tpu.vector_store %arg5[%c0_68, %c0_69], %151 {strides = array<i32>} : memref<8x128xf32, #tpu.memory_space<vmem>>, vector<8x128xf32>,
    return
  }
  func.func @transform_0(%arg0: i32) -> (i32, i32) {
    %c0_i32 = arith.constant 0 : i32
    %c0_i32_0 = arith.constant 0 : i32
    return %arg0, %c0_i32 : i32, i32
  }
  func.func @transform_1(%arg0: i32) -> (i32, i32) {
    %c0_i32 = arith.constant 0 : i32
    %c0_i32_0 = arith.constant 0 : i32
    %c0_i32_1 = arith.constant 0 : i32
    return %c0_i32, %c0_i32_0 : i32, i32
  }
  func.func @transform_2(%arg0: i32) -> (i32, i32) {
    %c0_i32 = arith.constant 0 : i32
    %c0_i32_0 = arith.constant 0 : i32
    %c0_i32_1 = arith.constant 0 : i32
    return %c0_i32, %c0_i32_0 : i32, i32
  }
  func.func @transform_3(%arg0: i32) -> (i32, i32, i32) {
    %c0_i32 = arith.constant 0 : i32
    %c0_i32_0 = arith.constant 0 : i32
    %c0_i32_1 = arith.constant 0 : i32
    return %c0_i32, %arg0, %c0_i32_0 : i32, i32, i32
  }
  func.func @transform_4(%arg0: i32) -> (i32, i32) {
    %c0_i32 = arith.constant 0 : i32
    %c0_i32_0 = arith.constant 0 : i32
    return %arg0, %c0_i32 : i32, i32
  }
}

</mosaic_0001>

<bundles_post_ra>
// kernel: tpu_custom_call.1
= control target key start
LH: loop header
LB: loop body
LE: loop exit
PB: predicated region body
PF: predicated region fallthrough
CT: control target
= control target key end

     0   :  { %9 = vsyncpa [#allocation3], 0  ;;  %s602_s0 = inlined_call_operand.hbm [shape: f32[8,128], index: 0, kind: input, shape index: {}]   ;;  %s603_s1 = inlined_call_operand.hbm [shape: f32[128,128], index: 1, kind: input, shape index: {}]   ;;  %s604_s2 = inlined_call_operand.vmem [shape: f32[1,128], index: 2, kind: input, shape index: {}]   ;;  %s605_s3 = inlined_call_operand.hbm [shape: s32[20,8,128], index: 3, kind: input, shape index: {}]   ;;  %s606_s4 = inlined_call_operand.hbm [shape: f32[8,128], index: 4, kind: output, shape index: {}]  }
   0x1   :  { %10 = vsyncpa [#allocation6], 0 }
   0x2   :  { %11 = vsyncpa [#allocation4], 0  ;;  %s490_s15 = smov [#allocation5]   ;;  %s396_s19 = scalar_lea.hbm %s603_s1, 2048 }
   0x3   :  { %s27_s16 = sshll.u32 %s490_s15, 4  ;;  %p397_p0 = scmp.ne.s32.totalorder %s603_s1, %s396_s19  ;;  %s28_s16 = int_to_ptr.vmem [resolvable:$true] %s27_s16 }
   0x4   :  { %p400_p1 = scmp.lt.u32.totalorder %s396_s19, %s603_s1 }
   0x6   :  { %p402_p2 = pnand %p400_p1, %p397_p0 }
   0x8   :  { %405 = shalt.err (!%p402_p2)
}
   0x9   :  { %s406_s24 = scalar_lea.vmem %s28_s16, 2048  ;;  %p411_p4 = scmp.lt.s32.totalorder %s28_s16, %s28_s16 }
   0xa   :  { %p407_p3 = scmp.ne.s32.totalorder %s28_s16, %s406_s24  ;;  %p412_p5 = scmp.lt.s32.totalorder %s406_s24, %s406_s24 }
   0xc   :  { %p413_p6 = por %p412_p5, %p411_p4 }
   0xe   :  { %p414_p7 = pnand %p413_p6, %p407_p3 }
  0x10   :  { %417 = shalt.err (!%p414_p7)
}
  0x11   :  { %s491_s25 = smov 128   ;;  %s492_s26 = smov 8  }
  0x12   :  { %33 = dma.hbm_to_vmem [thread:$0]  %s603_s1, 2048, %s28_s16, [#allocation6], %s491_s25, %s491_s25, %s492_s26  }
  0x13   :  { %s493_s29 = smov [#allocation2]   ;;  %s494_s5 = smov [#allocation7]  }
  0x14   :  { %s18_s30 = sshll.u32 %s493_s29, 4  ;;  %s41_s6 = sshll.u32 %s494_s5, 4  ;;  %s19_s30 = int_to_ptr.vmem [resolvable:$true] %s18_s30  ;;  %s42_s6 = int_to_ptr.vmem [resolvable:$true] %s41_s6 }
  0x15   :  { %s418_s9 = scalar_lea.hbm %s602_s0, 128 }
  0x16   :  { %p419_p8 = scmp.ne.s32.totalorder %s602_s0, %s418_s9  ;;  %p422_p9 = scmp.lt.u32.totalorder %s418_s9, %s602_s0 }
  0x18   :  { %p424_p10 = pnand %p422_p9, %p419_p8 }
  0x1a   :  { %427 = shalt.err (!%p424_p10)
}
  0x1b   :  { %s428_s1 = scalar_lea.vmem %s19_s30, 128  ;;  %p433_p12 = scmp.lt.s32.totalorder %s19_s30, %s19_s30 }
  0x1c   :  { %p429_p11 = scmp.ne.s32.totalorder %s19_s30, %s428_s1  ;;  %p434_p13 = scmp.lt.s32.totalorder %s428_s1, %s428_s1 }
  0x1e   :  { %p435_p0 = por %p434_p13, %p433_p12 }
  0x20   :  { %p436_p1 = pnand %p435_p0, %p429_p11 }
  0x22   :  { %439 = shalt.err (!%p436_p1)
}
  0x23   :  { %21 = dma.hbm_to_vmem [thread:$0]  %s602_s0, 128, %s19_s30, [#allocation3]  }
  0x24   :  { %s440_s18 = scalar_lea.hbm %s605_s3, 2560 }
  0x25   :  { %p441_p2 = scmp.ne.s32.totalorder %s605_s3, %s440_s18  ;;  %p444_p3 = scmp.lt.u32.totalorder %s440_s18, %s605_s3 }
  0x27   :  { %p446_p4 = pnand %p444_p3, %p441_p2 }
  0x29   :  { %449 = shalt.err (!%p446_p4)
}
  0x2a   :  { %s450_s23 = scalar_lea.vmem %s42_s6, 2560  ;;  %p455_p6 = scmp.lt.s32.totalorder %s42_s6, %s42_s6 }
  0x2b   :  { %p451_p5 = scmp.ne.s32.totalorder %s42_s6, %s450_s23  ;;  %p456_p7 = scmp.lt.s32.totalorder %s450_s23, %s450_s23 }
  0x2d   :  { %p457_p8 = por %p456_p7, %p455_p6 }
  0x2f   :  { %p458_p9 = pnand %p457_p8, %p451_p5 }
  0x31   :  { %461 = shalt.err (!%p458_p9)
}
  0x32   :  { %47 = dma.hbm_to_vmem [thread:$0]  %s605_s3, 2560, %s42_s6, [#allocation6], %s491_s25, %s491_s25, %s492_s26  }
  0x33   :  { %484 = dma.done.wait [#allocation3], 128  }
  0x34   :  { %485 = vsyncadd [#allocation3], 4294967168 }
  0x35   :  { %486 = dma.done.wait [#allocation6], 4608  }
  0x36   :  { %487 = vsyncadd [#allocation6], 4294962688  ;;  %v495_v0 = vmov 0.0|0.0   ;;  %vm496_vm0 = vmmov 0   ;;  %v497_v1 = vmov 0.0   ;;  %v58_v2 = vld [vmem:[#allocation5] sm:$0xff] }
  0x37   :  { %363 = vmatprep.subr.bf16.mxu0 %v495_v0  ;;  %360 = vmatprep.mubr.msk.f32.mxu0 %vm496_vm0, %v497_v1  ;;  %v59_v3 = vld [vmem:[#allocation5 + $0x8] sm:$0xff]  ;;  %v60_v4 = vld [vmem:[#allocation5 + $0x10] sm:$0xff]  ;;  %v61_v6 = vld [vmem:[#allocation5 + $0x18] sm:$0xff]  ;;  %s498_s26 = smov [#allocation8]  }
  0x38   :  { %v364_v5 = vpack.c.bf16 %v59_v3, %v58_v2  ;;  %v367_v7 = vpack.c.bf16 %v61_v6, %v60_v4  ;;  %v62_v8 = vld [vmem:[#allocation5 + $0x20] sm:$0xff]  ;;  %v63_v9 = vld [vmem:[#allocation5 + $0x28] sm:$0xff]  ;;  %v64_v11 = vld [vmem:[#allocation5 + $0x30] sm:$0xff]  ;;  %s280_s27 = sshll.u32 %s498_s26, 4  ;;  %s281_s27 = int_to_ptr.vmem [resolvable:$true] %s280_s27 }
  0x39   :  { %v370_v10 = vpack.c.bf16 %v63_v9, %v62_v8  ;;  %v65_v12 = vld [vmem:[#allocation5 + $0x38] sm:$0xff]  ;;  %v66_v14 = vld [vmem:[#allocation5 + $0x40] sm:$0xff]  ;;  %v67_v15 = vld [vmem:[#allocation5 + $0x48] sm:$0xff]  ;;  %s462_s28 = scalar_lea.vmem %s281_s27, 128  ;;  %p467_p11 = scmp.lt.s32.totalorder %s281_s27, %s281_s27 }
  0x3a   :  { %365 = vmatpush3.bf16.msra.mxu0 %v364_v5  ;;  %v373_v13 = vpack.c.bf16 %v65_v12, %v64_v11  ;;  %v376_v16 = vpack.c.bf16 %v67_v15, %v66_v14  ;;  %v68_v17 = vld [vmem:[#allocation5 + $0x50] sm:$0xff]  ;;  %v69_v18 = vld [vmem:[#allocation5 + $0x58] sm:$0xff]  ;;  %v70_v20 = vld [vmem:[#allocation5 + $0x60] sm:$0xff]  ;;  %p463_p10 = scmp.ne.s32.totalorder %s281_s27, %s462_s28  ;;  %p468_p12 = scmp.lt.s32.totalorder %s462_s28, %s462_s28 }
  0x3b   :  { %366 = vmatprep.subr.bf16.mxu0 %v495_v0  ;;  %v379_v19 = vpack.c.bf16 %v69_v18, %v68_v17  ;;  %v71_v21 = vld [vmem:[#allocation5 + $0x68] sm:$0xff]  ;;  %v72_v23 = vld [vmem:[#allocation5 + $0x70] sm:$0xff]  ;;  %v73_v24 = vld [vmem:[#allocation5 + $0x78] sm:$0xff] }
  0x3c   :  { %v382_v22 = vpack.c.bf16 %v71_v21, %v70_v20  ;;  %v385_v25 = vpack.c.bf16 %v73_v24, %v72_v23  ;;  %v57_v26 = vld [vmem:[#allocation2] sm:$0xff]  ;;  %v152_v27 = vld [vmem:[#allocation7] sm:$0xff]  ;;  %v158_v28 = vld [vmem:[#allocation7 + $0x8] sm:$0xff]  ;;  %p469_p13 = por %p468_p12, %p467_p11 }
  0x3d   :  { %vm153_vm1 = vcmp.lt.s32.totalorder %v152_v27, 8388608  ;;  %vm159_vm2 = vcmp.lt.s32.totalorder %v158_v28, 8388608  ;;  %v164_v29 = vld [vmem:[#allocation7 + $0x10] sm:$0xff]  ;;  %v170_v32 = vld [vmem:[#allocation7 + $0x18] sm:$0xff]  ;;  %v176_v35 = vld [vmem:[#allocation7 + $0x20] sm:$0xff] }
  0x3e   :  { %368 = vmatpush3.bf16.msra.mxu0 %v367_v7  ;;  %v291_v30 = vsel %vm153_vm1, 1.0, %v497_v1  ;;  %v292_v31 = vsel %vm159_vm2, 1.0, %v497_v1  ;;  %vm165_vm3 = vcmp.lt.s32.totalorder %v164_v29, 8388608  ;;  %vm171_vm4 = vcmp.lt.s32.totalorder %v170_v32, 8388608  ;;  %v182_v38 = vld [vmem:[#allocation7 + $0x28] sm:$0xff]  ;;  %v188_v41 = vld [vmem:[#allocation7 + $0x30] sm:$0xff]  ;;  %p470_p0 = pnand %p469_p13, %p463_p10 }
  0x3f   :  { %369 = vmatprep.subr.bf16.mxu0 %v495_v0  ;;  %v162_v33 = vadd.f32 %v292_v31, %v291_v30  ;;  %v293_v34 = vsel %vm165_vm3, 1.0, %v497_v1  ;;  %v294_v37 = vsel %vm171_vm4, 1.0, %v497_v1  ;;  %vm177_vm5 = vcmp.lt.s32.totalorder %v176_v35, 8388608  ;;  %v194_v44 = vld [vmem:[#allocation7 + $0x38] sm:$0xff]  ;;  %v200_v47 = vld [vmem:[#allocation7 + $0x40] sm:$0xff]  ;;  %v206_v50 = vld [vmem:[#allocation7 + $0x48] sm:$0xff] }
  0x40   :  { %v295_v40 = vsel %vm177_vm5, 1.0, %v497_v1  ;;  %vm183_vm6 = vcmp.lt.s32.totalorder %v182_v38, 8388608  ;;  %vm189_vm7 = vcmp.lt.s32.totalorder %v188_v41, 8388608  ;;  %vm195_vm8 = vcmp.lt.s32.totalorder %v194_v44, 8388608  ;;  %v212_v53 = vld [vmem:[#allocation7 + $0x50] sm:$0xff]  ;;  %v218_v56 = vld [vmem:[#allocation7 + $0x58] sm:$0xff] }
  0x41   :  { %v168_v36 = vadd.f32 %v293_v34, %v162_v33  ;;  %v296_v43 = vsel %vm183_vm6, 1.0, %v497_v1  ;;  %v297_v46 = vsel %vm189_vm7, 1.0, %v497_v1  ;;  %v298_v49 = vsel %vm195_vm8, 1.0, %v497_v1  ;;  %v224_v59 = vld [vmem:[#allocation7 + $0x60] sm:$0xff]  ;;  %v230_v62 = vld [vmem:[#allocation7 + $0x68] sm:$0xff]  ;;  %v236_v2 = vld [vmem:[#allocation7 + $0x70] sm:$0xff] }
  0x42   :  { %371 = vmatpush3.bf16.msra.mxu0 %v370_v10  ;;  %vm201_vm9 = vcmp.lt.s32.totalorder %v200_v47, 8388608  ;;  %vm207_vm10 = vcmp.lt.s32.totalorder %v206_v50, 8388608  ;;  %vm213_vm11 = vcmp.lt.s32.totalorder %v212_v53, 8388608  ;;  %vm219_vm12 = vcmp.lt.s32.totalorder %v218_v56, 8388608  ;;  %v242_v5 = vld [vmem:[#allocation7 + $0x78] sm:$0xff]  ;;  %v248_v8 = vld [vmem:[#allocation7 + $0x80] sm:$0xff] }
  0x43   :  { %372 = vmatprep.subr.bf16.mxu0 %v495_v0  ;;  %v174_v39 = vadd.f32 %v294_v37, %v168_v36  ;;  %v299_v52 = vsel %vm201_vm9, 1.0, %v497_v1  ;;  %v300_v55 = vsel %vm207_vm10, 1.0, %v497_v1  ;;  %v301_v58 = vsel %vm213_vm11, 1.0, %v497_v1  ;;  %v254_v11 = vld [vmem:[#allocation7 + $0x88] sm:$0xff]  ;;  %v260_v14 = vld [vmem:[#allocation7 + $0x90] sm:$0xff]  ;;  %v266_v17 = vld [vmem:[#allocation7 + $0x98] sm:$0xff] }
  0x44   :  { %v302_v61 = vsel %vm219_vm12, 1.0, %v497_v1  ;;  %vm225_vm13 = vcmp.lt.s32.totalorder %v224_v59, 8388608  ;;  %vm231_vm14 = vcmp.lt.s32.totalorder %v230_v62, 8388608  ;;  %vm237_vm15 = vcmp.lt.s32.totalorder %v236_v2, 8388608  ;;  %v290_v21 = vld [vmem:[%s604_s2] ss:$0 sm:$0xff] }
  0x45   :  { %v180_v42 = vadd.f32 %v295_v40, %v174_v39  ;;  %v304_v4 = vsel %vm231_vm14, 1.0, %v497_v1  ;;  %v305_v7 = vsel %vm237_vm15, 1.0, %v497_v1  ;;  %vm243_vm0 = vcmp.lt.s32.totalorder %v242_v5, 8388608 }
  0x46   :  { %374 = vmatpush3.bf16.msra.mxu0 %v373_v13  ;;  %v306_v10 = vsel %vm243_vm0, 1.0, %v497_v1  ;;  %vm249_vm1 = vcmp.lt.s32.totalorder %v248_v8, 8388608  ;;  %vm255_vm2 = vcmp.lt.s32.totalorder %v254_v11, 8388608  ;;  %vm261_vm3 = vcmp.lt.s32.totalorder %v260_v14, 8388608 }
  0x47   :  { %375 = vmatprep.subr.bf16.mxu0 %v495_v0  ;;  %v186_v45 = vadd.f32 %v296_v43, %v180_v42  ;;  %v307_v13 = vsel %vm249_vm1, 1.0, %v497_v1  ;;  %vm267_vm4 = vcmp.lt.s32.totalorder %v266_v17, 8388608 }
  0x49   :  { %v192_v48 = vadd.f32 %v297_v46, %v186_v45 }
  0x4a   :  { %377 = vmatpush3.bf16.msra.mxu0 %v376_v16  ;;  %v308_v16 = vsel %vm255_vm2, 1.0, %v497_v1 }
  0x4b   :  { %378 = vmatprep.subr.bf16.mxu0 %v495_v0  ;;  %v198_v51 = vadd.f32 %v298_v49, %v192_v48 }
  0x4d   :  { %v204_v54 = vadd.f32 %v299_v52, %v198_v51 }
  0x4e   :  { %380 = vmatpush3.bf16.msra.mxu0 %v379_v19  ;;  %v309_v19 = vsel %vm261_vm3, 1.0, %v497_v1 }
  0x4f   :  { %381 = vmatprep.subr.bf16.mxu0 %v495_v0  ;;  %v210_v57 = vadd.f32 %v300_v55, %v204_v54 }
  0x51   :  { %v216_v60 = vadd.f32 %v301_v58, %v210_v57 }
  0x52   :  { %383 = vmatpush3.bf16.msra.mxu0 %v382_v22  ;;  %v310_v22 = vsel %vm267_vm4, 1.0, %v497_v1 }
  0x53   :  { %384 = vmatprep.subr.bf16.mxu0 %v495_v0  ;;  %v222_v63 = vadd.f32 %v302_v61, %v216_v60  ;;  %v303_v0 = vsel %vm225_vm13, 1.0, %v497_v1 }
  0x55   :  { %v228_v3 = vadd.f32 %v303_v0, %v222_v63 }
  0x56   :  { %386 = vmatpush3.bf16.msra.mxu0 %v385_v25 }
  0x57   :  { %v234_v6 = vadd.f32 %v304_v4, %v228_v3 }
  0x59   :  { %361 = vmatmul.mubr.f32.vlgmr.msra.gmra.mrb[0].mxu0 %v57_v26  ;;  %v240_v9 = vadd.f32 %v305_v7, %v234_v6 }
  0x5b   :  { %v246_v12 = vadd.f32 %v306_v10, %v240_v9 }
  0x5d   :  { %v252_v15 = vadd.f32 %v307_v13, %v246_v12 }
  0x5f   :  { %v258_v18 = vadd.f32 %v308_v16, %v252_v15 }
  0x61   :  { %v264_v20 = vadd.f32 %v309_v19, %v258_v18 }
  0x63   :  { %v270_v25 = vadd.f32 %v310_v22, %v264_v20 }
 0x12c   :  { %v147_v23 = vpop.f32.mrb[0].mxu0 }
 0x12d   :  { %v148_v24 = vadd.f32 %v290_v21, %v147_v23  ;;  %v362_v26 = vpop.f32.mrb[1].mxu0 }
 0x12f   :  { %v151_v27 = vmax.f32 %v148_v24, 0.0 }
 0x131   :  { %v271_v28 = vmul.f32 %v270_v25, %v151_v27 }
 0x133   :  { %v272_v29 = vmul.f32 0.1, %v271_v28 }
 0x135   :  { %273 = vst [vmem:[#allocation8] sm:$0xff] %v272_v29 }
 0x136   :  { %473 = shalt.err (!%p470_p0)
}
 0x137   :  { %s474_s30 = scalar_lea.hbm %s606_s4, 128 }
 0x138   :  { %p475_p1 = scmp.ne.s32.totalorder %s606_s4, %s474_s30  ;;  %p478_p2 = scmp.lt.u32.totalorder %s474_s30, %s606_s4 }
 0x13a   :  { %p480_p3 = pnand %p478_p2, %p475_p1 }
 0x13c   :  { %483 = shalt.err (!%p480_p3)
}
 0x13d   :  { %283 = dma.vmem_to_hbm [thread:$0]  %s281_s27, 128, %s606_s4, [#allocation4]  }
 0x13e   :  { %488 = dma.done.wait [#allocation4], 128  }
 0x13f   :  { %489 = vsyncadd [#allocation4], 4294967168 }
 0x140   :  { %287 = vsyncpa [#allocation3], 1 }
 0x141   :  { %288 = vsyncpa [#allocation6], 1 }
 0x142   :  { %289 = vsyncpa [#allocation4], 1 }

</bundles_post_ra>
